<compile_context>
chip_gen: v6e
topology: v6e:2x2x1
jax: 0.10.0
libtpu: 0.0.40
codegen_flags: <defaults>
</compile_context>

<pallas_src>
import jax
import jax.numpy as jnp
from jax import lax
from jax.experimental import pallas as pl
from jax.experimental.pallas import tpu as pltpu

LANE = 128
MXU_M = 128   # row-tile granularity: one MXU M tile, also a multiple of bf16 sublane pack


def _round_up(x, m):
    return (x + m - 1) // m * m


# ---------------------------------------------------------------------------
# Pallas kernels: fused conv3x3 (+BN1 bias, ReLU) -> conv1x1 (+BN2) -> +identity -> ReLU
# ---------------------------------------------------------------------------
def _make_kernel(split_downsample, *, cmid_p, cin, ctr_off):
    if split_downsample:
        # Downsample as its own small dot on the lane-aligned center-tap slice.
        def kernel(patches_ref, w1_ref, b1_ref, w2_ref, wd_ref, bc_ref, out_ref):
            t = jnp.dot(patches_ref[...], w1_ref[...],
                        preferred_element_type=jnp.float32)
            mid = jnp.maximum(t + b1_ref[...], 0.0)                     # BN1 bias + ReLU
            ctr = patches_ref[:, ctr_off:ctr_off + cin]                 # center tap of patch
            acc = jnp.dot(ctr, wd_ref[...],                             # identity branch
                          preferred_element_type=jnp.float32) + bc_ref[...]
            acc = acc + jnp.dot(mid.astype(w2_ref.dtype), w2_ref[...],  # conv2 (BN2 folded)
                                preferred_element_type=jnp.float32)
            out_ref[...] = jnp.maximum(acc, 0.0).astype(out_ref.dtype)  # short_add + ReLU
    else:
        # Downsample weight embedded into extra output columns of the first matmul.
        def kernel(patches_ref, w1_ref, b1_ref, w2_ref, bc_ref, out_ref):
            t = jnp.dot(patches_ref[...], w1_ref[...],
                        preferred_element_type=jnp.float32)
            mid = jnp.maximum(t[:, :cmid_p] + b1_ref[...], 0.0)         # BN1 bias + ReLU
            acc = t[:, cmid_p:] + bc_ref[...]                           # identity + (b2+bd)
            acc = acc + jnp.dot(mid.astype(w2_ref.dtype), w2_ref[...],  # conv2 (BN2 folded)
                                preferred_element_type=jnp.float32)
            out_ref[...] = jnp.maximum(acc, 0.0).astype(out_ref.dtype)  # short_add + ReLU
    return kernel


def _mixvarge_pallas(patches, arrays, meta, *, tm, out_dtype):
    Mp, K1p = patches.shape
    CmidP, CoutP = meta["CmidP"], meta["CoutP"]
    split = meta["split_downsample"]
    Cin, ctr_off = meta["Cin"], meta["ctr_off"]

    grid = (Mp // tm,)
    rows = lambda i: (i, 0)        # row-tiled activations / output
    full = lambda i: (0, 0)        # weights / bias vectors resident every step

    kernel = _make_kernel(split, cmid_p=CmidP, cin=Cin, ctr_off=ctr_off)

    w1_cols = arrays["w1"].shape[1]
    in_specs = [
        pl.BlockSpec((tm, K1p), rows),        # im2col patches (lane-dense K1p)
        pl.BlockSpec((K1p, w1_cols), full),   # conv1*s1 (+ embedded downsample cols)
        pl.BlockSpec((1, CmidP), full),       # BN1 folded bias
        pl.BlockSpec((CmidP, CoutP), full),   # conv2*s2
    ]
    operands = [patches, arrays["w1"], arrays["b1"], arrays["w2"]]
    if split:
        in_specs.append(pl.BlockSpec((Cin, CoutP), full))   # downsample*sd
        operands.append(arrays["wd"])
    in_specs.append(pl.BlockSpec((1, CoutP), full))          # b2 + bd
    operands.append(arrays["bc"])

    # --- VMEM budget (double-buffered streams + resident weights) -----------------
    in_bytes = jnp.dtype(patches.dtype).itemsize
    w_bytes = jnp.dtype(arrays["w1"].dtype).itemsize
    out_bytes = jnp.dtype(out_dtype).itemsize
    weight_bytes = (K1p * w1_cols + CmidP * CoutP
                    + (Cin * CoutP if split else 0)) * w_bytes \
                   + (CmidP + CoutP) * 4
    stream_bytes = tm * K1p * in_bytes + tm * CoutP * out_bytes
    vmem_limit = int(min(2 * (weight_bytes + stream_bytes) + (4 << 20), 64 << 20))

    # --- Cost estimate so XLA can overlap surrounding im2col/pad/slice ops ---------
    flops = 2 * Mp * K1p * w1_cols + 2 * Mp * CmidP * CoutP
    if split:
        flops += 2 * Mp * Cin * CoutP
    bytes_accessed = Mp * K1p * in_bytes + weight_bytes + Mp * CoutP * out_bytes
    cost = pl.CostEstimate(flops=int(flops), transcendentals=0,
                           bytes_accessed=int(bytes_accessed))

    return pl.pallas_call(
        kernel,
        out_shape=jax.ShapeDtypeStruct((Mp, CoutP), out_dtype),
        grid_spec=pltpu.PrefetchScalarGridSpec(
            num_scalar_prefetch=0,
            grid=grid,
            in_specs=in_specs,
            out_specs=pl.BlockSpec((tm, CoutP), rows),
        ),
        compiler_params=pltpu.CompilerParams(
            dimension_semantics=("parallel",),
            vmem_limit_bytes=vmem_limit),
        cost_estimate=cost,
    )(*operands)


# ---------------------------------------------------------------------------
# JAX glue: BN folding + weight packing (hoisted), im2col, full forward
# ---------------------------------------------------------------------------
def fold_bn(gamma, beta, mean, var, eps=1e-5):
    scale = gamma / jnp.sqrt(var + eps)
    bias = beta - mean * scale
    return scale, bias


def pack_params(w1_hwio, bn1, w2_hwio, bn2, wd_hwio, bnd, *, stride,
                compute_dtype=jnp.bfloat16):
    """Fold BN into conv weights and pack lane-dense, MXU-ready operands.

    Call once per checkpoint; per-forward path only runs im2col + the kernel."""
    kh, kw, Cin, Cmid = w1_hwio.shape
    assert kh == kw and kh % 2 == 1, "conv1 must be square with odd kernel size"
    k = kh
    assert w2_hwio.shape[0] == 1 and w2_hwio.shape[1] == 1 and w2_hwio.shape[2] == Cmid, \
        "conv2 must be 1x1 (stride 1, padding 0)"
    Cout = w2_hwio.shape[3]
    # The center-tap identity trick requires: downsample is 1x1 / pad 0 / same stride
    # as conv1, and conv1 pad == (k-1)//2 (as in the PyTorch block).
    assert wd_hwio.shape == (1, 1, Cin, Cout), "downsample must be a 1x1 conv"
    assert stride >= 1

    s1, b1 = fold_bn(*bn1)
    s2, b2 = fold_bn(*bn2)
    sd, bd = fold_bn(*bnd)

    K1 = k * k * Cin
    K1p = _round_up(K1, LANE)        # lane-dense contraction dim (zero rows are free)
    CmidP = _round_up(Cmid, LANE)
    CoutP = _round_up(Cout, LANE)

    w1_mat = w1_hwio.reshape(K1, Cmid) * s1[None, :]     # (kh, kw, Cin) row order
    w2_mat = w2_hwio.reshape(Cmid, Cout) * s2[None, :]
    wd_mat = wd_hwio.reshape(Cin, Cout) * sd[None, :]

    ctr = (k // 2) * k + (k // 2)    # center-tap index in (kh, kw) order
    ctr_off = ctr * Cin
    # Split the downsample into its own dot only when its patch slice is lane-aligned
    # (no cross-lane relayout); otherwise embed it into extra columns of w1.
    split_downsample = (Cin % LANE == 0)

    if split_downsample:
        w1_big = jnp.zeros((K1p, CmidP), jnp.float32).at[:K1, :Cmid].set(w1_mat)
        wd_p = jnp.zeros((Cin, CoutP), jnp.float32).at[:, :Cout].set(wd_mat)
        wd_p = wd_p.astype(compute_dtype)
    else:
        w1_big = jnp.zeros((K1p, CmidP + CoutP), jnp.float32)
        w1_big = w1_big.at[:K1, :Cmid].set(w1_mat)
        w1_big = w1_big.at[ctr_off:ctr_off + Cin, CmidP:CmidP + Cout].set(wd_mat)
        wd_p = None

    w2p = jnp.zeros((CmidP, CoutP), jnp.float32).at[:Cmid, :Cout].set(w2_mat)
    b1p = jnp.zeros((1, CmidP), jnp.float32).at[0, :Cmid].set(b1)
    bcp = jnp.zeros((1, CoutP), jnp.float32).at[0, :Cout].set(b2 + bd)

    arrays = dict(w1=w1_big.astype(compute_dtype),
                  w2=w2p.astype(compute_dtype),
                  wd=wd_p,
                  b1=b1p, bc=bcp)
    meta = dict(k=k, stride=stride, Cin=Cin, Cmid=Cmid, Cout=Cout,
                K1=K1, K1p=K1p, CmidP=CmidP, CoutP=CoutP,
                ctr_off=ctr_off, split_downsample=split_downsample,
                compute_dtype=compute_dtype)
    return arrays, meta


def im2col(x_nhwc, k, stride, pad):
    """Extract kxk patches -> (N*Ho*Wo, k*k*C) with (kh, kw, C) feature order."""
    N, H, W, C = x_nhwc.shape
    xp = jnp.pad(x_nhwc, ((0, 0), (pad, pad), (pad, pad), (0, 0)))
    Ho = (H + 2 * pad - k) // stride + 1
    Wo = (W + 2 * pad - k) // stride + 1
    cols = []
    for dh in range(k):
        for dw in range(k):
            cols.append(xp[:, dh:dh + stride * Ho:stride, dw:dw + stride * Wo:stride, :])
    patches = jnp.concatenate(cols, axis=-1)             # (N, Ho, Wo, k*k*C)
    return patches.reshape(N * Ho * Wo, k * k * C), (N, Ho, Wo)


def basic_mixvarge_forward(x_nhwc, arrays, meta, *, out_dtype=None, tm_max=512):
    """Fused forward of BasicMixVarGEBlock (eval-mode BN, single-tensor input path)."""
    k, stride = meta["k"], meta["stride"]
    Cin, Cout = meta["Cin"], meta["Cout"]
    K1, K1p = meta["K1"], meta["K1p"]
    compute_dtype = meta["compute_dtype"]
    out_dtype = compute_dtype if out_dtype is None else out_dtype
    pad = (k - 1) // 2

    N, H, W, C = x_nhwc.shape
    assert C == Cin

    # TODO(synk): replace the HBM-materialized im2col (k^2 read amplification) with an
    # in-kernel halo-DMA accumulation over the NHWC input; done in compute_dtype here so
    # the dominant HBM stream is already halved vs f32.
    x_c = x_nhwc.astype(compute_dtype)
    patches, (_, Ho, Wo) = im2col(x_c, k, stride, pad)
    M = patches.shape[0]

    # Zero-pad the contraction dim to a lane multiple (numerically free).
    if K1p != K1:
        patches = jnp.pad(patches, ((0, 0), (0, K1p - K1)))

    # Row tile: MXU granular (full matmul passes / unmasked stores); when a single tile
    # would cover all rows and there is enough work, split so the 'parallel' axis has at
    # least 2 grid steps (feeds both v7x TensorCores).
    tm = min(tm_max, _round_up(M, MXU_M))
    if _round_up(M, tm) // tm < 2 and M > MXU_M:
        tm = max(MXU_M, _round_up(pl.cdiv(M, 2), MXU_M))
    Mp = _round_up(M, tm)
    if Mp != M:
        patches = jnp.pad(patches, ((0, Mp - M), (0, 0)))

    out_flat = _mixvarge_pallas(patches, arrays, meta, tm=tm, out_dtype=out_dtype)
    out_flat = out_flat[:M, :Cout]                # drop row / lane padding
    return out_flat.reshape(N, Ho, Wo, Cout)


# ---------------------------------------------------------------------------
# Reference model (pure JAX) and parameter init
# ---------------------------------------------------------------------------
def make_bn_params(key, c):
    k1, k2, k3, k4 = jax.random.split(key, 4)
    gamma = 1.0 + 0.1 * jax.random.normal(k1, (c,), jnp.float32)
    beta = 0.1 * jax.random.normal(k2, (c,), jnp.float32)
    mean = 0.1 * jax.random.normal(k3, (c,), jnp.float32)
    var = jnp.abs(1.0 + 0.1 * jax.random.normal(k4, (c,), jnp.float32))
    return gamma, beta, mean, var


def reference_forward(x_nhwc, w1_hwio, bn1, w2_hwio, bn2, wd_hwio, bnd, stride):
    def conv_bn(x, w, bn, s, pad, relu):
        y = lax.conv_general_dilated(
            x, w, (s, s), [(pad, pad), (pad, pad)],
            dimension_numbers=("NHWC", "HWIO", "NHWC"))
        scale, bias = fold_bn(*bn)
        y = y * scale.reshape(1, 1, 1, -1) + bias.reshape(1, 1, 1, -1)
        return jnp.maximum(y, 0.0) if relu else y

    k = w1_hwio.shape[0]
    identity = conv_bn(x_nhwc, wd_hwio, bnd, stride, 0, relu=False)
    out = conv_bn(x_nhwc, w1_hwio, bn1, stride, (k - 1) // 2, relu=True)
    out = conv_bn(out, w2_hwio, bn2, 1, 0, relu=False)
    return jnp.maximum(out + identity, 0.0)


def _make_case(key, N, Cin, H, W, Cout, k, w_scale):
    keys = jax.random.split(key, 8)
    Cmid = Cout                                            # factor == 1
    x_nchw = jax.random.normal(keys[0], (N, Cin, H, W), jnp.float32)
    x_nhwc = jnp.transpose(x_nchw, (0, 2, 3, 1))
    w1_oihw = w_scale * jax.random.normal(keys[1], (Cmid, Cin, k, k), jnp.float32)
    w2_oihw = w_scale * jax.random.normal(keys[2], (Cout, Cmid, 1, 1), jnp.float32)
    wd_oihw = w_scale * jax.random.normal(keys[3], (Cout, Cin, 1, 1), jnp.float32)
    w1_hwio = jnp.transpose(w1_oihw, (2, 3, 1, 0))
    w2_hwio = jnp.transpose(w2_oihw, (2, 3, 1, 0))
    wd_hwio = jnp.transpose(wd_oihw, (2, 3, 1, 0))
    bn1 = make_bn_params(keys[4], Cmid)
    bn2 = make_bn_params(keys[5], Cout)
    bnd = make_bn_params(keys[6], Cout)
    return x_nhwc, w1_hwio, bn1, w2_hwio, bn2, wd_hwio, bnd


if __name__ == "__main__":
    stride = 2
    key = jax.random.PRNGKey(0)
    key_a, key_b = jax.random.split(key)

    # ---------------- Case A: toy block (Cin=8) -> embedded-downsample path -------
    N, Cin, H, W, Cout, k1 = 2, 8, 16, 16, 16, 3
    (x_nhwc, w1_hwio, bn1, w2_hwio, bn2, wd_hwio, bnd) = _make_case(
        key_a, N, Cin, H, W, Cout, k1, w_scale=0.2)

    ref_nhwc = reference_forward(x_nhwc, w1_hwio, bn1, w2_hwio, bn2, wd_hwio, bnd, stride)
    ref_nchw = jnp.transpose(ref_nhwc, (0, 3, 1, 2))

    # f32 operands / f32 output: tight numerical check
    arr32, meta32 = pack_params(w1_hwio, bn1, w2_hwio, bn2, wd_hwio, bnd,
                                stride=stride, compute_dtype=jnp.float32)
    out_f32 = basic_mixvarge_forward(x_nhwc, arr32, meta32)
    out_f32 = jax.block_until_ready(out_f32)
    out_f32_nchw = jnp.transpose(out_f32, (0, 3, 1, 2))
    assert out_f32_nchw.shape == (N, Cout, H // stride, W // stride)
    err32 = float(jnp.max(jnp.abs(out_f32_nchw - ref_nchw)))
    assert jnp.allclose(out_f32_nchw, ref_nchw, atol=1e-4, rtol=1e-4), err32

    # bf16 operands / bf16 output (recommended on v5e/v6e/v7x): loose check
    arr16, meta16 = pack_params(w1_hwio, bn1, w2_hwio, bn2, wd_hwio, bnd,
                                stride=stride, compute_dtype=jnp.bfloat16)
    out_bf16 = basic_mixvarge_forward(x_nhwc, arr16, meta16)
    out_bf16 = jax.block_until_ready(out_bf16)
    out_bf16_nchw = jnp.transpose(out_bf16.astype(jnp.float32), (0, 3, 1, 2))
    err16 = float(jnp.max(jnp.abs(out_bf16_nchw - ref_nchw)))
    assert jnp.allclose(out_bf16_nchw, ref_nchw, atol=1.5e-1, rtol=5e-2), err16

    # ---------------- Case B: lane-aligned Cin=128 -> split-downsample path -------
    Nb, Cinb, Hb, Wb, Coutb = 1, 128, 8, 8, 32
    (xb, w1b, bn1b, w2b, bn2b, wdb, bndb) = _make_case(
        key_b, Nb, Cinb, Hb, Wb, Coutb, k1, w_scale=0.05)

    refb = reference_forward(xb, w1b, bn1b, w2b, bn2b, wdb, bndb, stride)
    arrb, metab = pack_params(w1b, bn1b, w2b, bn2b, wdb, bndb,
                              stride=stride, compute_dtype=jnp.float32)
    assert metab["split_downsample"]
    outb = basic_mixvarge_forward(xb, arrb, metab)
    outb = jax.block_until_ready(outb)
    assert outb.shape == (Nb, Hb // stride, Wb // stride, Coutb)
    errb = float(jnp.max(jnp.abs(outb - refb)))
    assert jnp.allclose(outb, refb, atol=1e-2, rtol=1e-3), errb

    print("KERNEL_OK")
</pallas_src>

<mosaic_0001>
module attributes {stable_mosaic.version = 11 : i64} {
  func.func @kernel(%arg0: i32, %arg1: memref<128x128xf32, #tpu.memory_space<vmem>>, %arg2: memref<128x256xf32, #tpu.memory_space<vmem>>, %arg3: memref<1x128xf32, #tpu.memory_space<vmem>>, %arg4: memref<128x128xf32, #tpu.memory_space<vmem>>, %arg5: memref<1x128xf32, #tpu.memory_space<vmem>>, %arg6: memref<128x128xf32, #tpu.memory_space<vmem>>) attributes {dimension_semantics = [#tpu.dimension_semantics<parallel>], iteration_bounds = array<i64: 1>, scalar_prefetch = 0 : i64, scratch_operands = 0 : i64, tpu.core_type = #tpu.core_type<tc>, window_params = [{transform_indices = @transform_0, window_bounds = array<i64: 128, 128>}, {pipeline_mode = #tpu.pipeline_mode<synchronous>, transform_indices = @transform_1, window_bounds = array<i64: 128, 256>}, {pipeline_mode = #tpu.pipeline_mode<synchronous>, transform_indices = @transform_2, window_bounds = array<i64: 1, 128>}, {pipeline_mode = #tpu.pipeline_mode<synchronous>, transform_indices = @transform_3, window_bounds = array<i64: 128, 128>}, {pipeline_mode = #tpu.pipeline_mode<synchronous>, transform_indices = @transform_4, window_bounds = array<i64: 1, 128>}, {transform_indices = @transform_5, window_bounds = array<i64: 128, 128>}]} {
    %c0 = arith.constant 0 : index
    %c0_0 = arith.constant 0 : index
    %0 = vector.load %arg1[%c0, %c0_0] : memref<128x128xf32, #tpu.memory_space<vmem>>, vector<128x128xf32>
    %c0_1 = arith.constant 0 : index
    %c0_2 = arith.constant 0 : index
    %1 = vector.load %arg2[%c0_1, %c0_2] : memref<128x256xf32, #tpu.memory_space<vmem>>, vector<128x256xf32>
    %cst = arith.constant dense<0.000000e+00> : vector<128x256xf32>
    %2 = tpu.matmul %0, %1, %cst {dimension_numbers = #tpu.dot_dimension_numbers<[1], [0], [0], [1], [0, 0, 1, 1], [], []>} : vector<128x128xf32>, vector<128x256xf32>, vector<128x256xf32> -> vector<128x256xf32>
    %3 = vector.extract_strided_slice %2 {offsets = [0, 0], sizes = [128, 128], strides = [1, 1]} : vector<128x256xf32> to vector<128x128xf32>
    %c0_3 = arith.constant 0 : index
    %c0_4 = arith.constant 0 : index
    %4 = vector.load %arg3[%c0_3, %c0_4] : memref<1x128xf32, #tpu.memory_space<vmem>>, vector<1x128xf32>
    %5 = vector.broadcast %4 : vector<1x128xf32> to vector<128x128xf32>
    %6 = arith.addf %3, %5 : vector<128x128xf32>
    %cst_5 = arith.constant 0.000000e+00 : f32
    %7 = vector.broadcast %cst_5 : f32 to vector<128x128xf32>
    %8 = arith.maximumf %6, %7 : vector<128x128xf32>
    %9 = vector.extract_strided_slice %2 {offsets = [0, 128], sizes = [128, 128], strides = [1, 1]} : vector<128x256xf32> to vector<128x128xf32>
    %c0_6 = arith.constant 0 : index
    %c0_7 = arith.constant 0 : index
    %10 = vector.load %arg5[%c0_6, %c0_7] : memref<1x128xf32, #tpu.memory_space<vmem>>, vector<1x128xf32>
    %11 = vector.broadcast %10 : vector<1x128xf32> to vector<128x128xf32>
    %12 = arith.addf %9, %11 : vector<128x128xf32>
    %c0_8 = arith.constant 0 : index
    %c0_9 = arith.constant 0 : index
    %13 = vector.load %arg4[%c0_8, %c0_9] : memref<128x128xf32, #tpu.memory_space<vmem>>, vector<128x128xf32>
    %cst_10 = arith.constant dense<0.000000e+00> : vector<128x128xf32>
    %14 = tpu.matmul %8, %13, %cst_10 {dimension_numbers = #tpu.dot_dimension_numbers<[1], [0], [0], [1], [0, 0, 1, 1], [], []>} : vector<128x128xf32>, vector<128x128xf32>, vector<128x128xf32> -> vector<128x128xf32>
    %15 = arith.addf %12, %14 : vector<128x128xf32>
    %cst_11 = arith.constant 0.000000e+00 : f32
    %16 = vector.broadcast %cst_11 : f32 to vector<128x128xf32>
    %17 = arith.maximumf %15, %16 : vector<128x128xf32>
    %c0_12 = arith.constant 0 : index
    %c0_13 = arith.constant 0 : index
    %18 = vector.load %arg6[%c0_12, %c0_13] : memref<128x128xf32, #tpu.memory_space<vmem>>, vector<128x128xf32>
    tpu.vector_store %arg6[%c0_12, %c0_13], %17 {strides = array<i32>} : memref<128x128xf32, #tpu.memory_space<vmem>>, vector<128x128xf32>,
    return
  }
  func.func @transform_0(%arg0: i32) -> (i32, i32) {
    %c0_i32 = arith.constant 0 : i32
    %c0_i32_0 = arith.constant 0 : i32
    return %arg0, %c0_i32 : i32, i32
  }
  func.func @transform_1(%arg0: i32) -> (i32, i32) {
    %c0_i32 = arith.constant 0 : i32
    %c0_i32_0 = arith.constant 0 : i32
    %c0_i32_1 = arith.constant 0 : i32
    return %c0_i32, %c0_i32_0 : i32, i32
  }
  func.func @transform_2(%arg0: i32) -> (i32, i32) {
    %c0_i32 = arith.constant 0 : i32
    %c0_i32_0 = arith.constant 0 : i32
    %c0_i32_1 = arith.constant 0 : i32
    return %c0_i32, %c0_i32_0 : i32, i32
  }
  func.func @transform_3(%arg0: i32) -> (i32, i32) {
    %c0_i32 = arith.constant 0 : i32
    %c0_i32_0 = arith.constant 0 : i32
    %c0_i32_1 = arith.constant 0 : i32
    return %c0_i32, %c0_i32_0 : i32, i32
  }
  func.func @transform_4(%arg0: i32) -> (i32, i32) {
    %c0_i32 = arith.constant 0 : i32
    %c0_i32_0 = arith.constant 0 : i32
    %c0_i32_1 = arith.constant 0 : i32
    return %c0_i32, %c0_i32_0 : i32, i32
  }
  func.func @transform_5(%arg0: i32) -> (i32, i32) {
    %c0_i32 = arith.constant 0 : i32
    %c0_i32_0 = arith.constant 0 : i32
    return %arg0, %c0_i32 : i32, i32
  }
}

</mosaic_0001>

<bundles_post_ra>
// kernel: tpu_custom_call.1
= control target key start
LH: loop header
LB: loop body
LE: loop exit
PB: predicated region body
PF: predicated region fallthrough
CT: control target
= control target key end

     0   :  { %10 = vsyncpa [#allocation3], 0  ;;  %s908_s0 = inlined_call_operand.hbm [shape: f32[128,128], index: 0, kind: input, shape index: {}]   ;;  %s909_s1 = inlined_call_operand.hbm [shape: f32[128,256], index: 1, kind: input, shape index: {}]   ;;  %s910_s2 = inlined_call_operand.vmem [shape: f32[1,128], index: 2, kind: input, shape index: {}]   ;;  %s911_s3 = inlined_call_operand.hbm [shape: f32[128,128], index: 3, kind: input, shape index: {}]   ;;  %s912_s4 = inlined_call_operand.vmem [shape: f32[1,128], index: 4, kind: input, shape index: {}]   ;;  %s913_s5 = inlined_call_operand.hbm [shape: f32[128,128], index: 5, kind: output, shape index: {}]  }
   0x1   :  { %11 = vsyncpa [#allocation6], 0 }
   0x2   :  { %12 = vsyncpa [#allocation4], 0  ;;  %s745_s18 = smov [#allocation5]  }
   0x3   :  { %s30_s19 = sshll.u32 %s745_s18, 4  ;;  %s31_s19 = int_to_ptr.vmem [resolvable:$true] %s30_s19 }
   0x4   :  { %s667_s20 = scalar_lea.vmem %s31_s19, 4096  ;;  %p672_p1 = scmp.lt.s32.totalorder %s31_s19, %s31_s19 }
   0x5   :  { %p668_p0 = scmp.ne.s32.totalorder %s31_s19, %s667_s20  ;;  %p673_p2 = scmp.lt.s32.totalorder %s667_s20, %s667_s20 }
   0x7   :  { %p674_p3 = por %p673_p2, %p672_p1 }
   0x9   :  { %p675_p4 = pnand %p674_p3, %p668_p0 }
   0xb   :  { %678 = shalt.err (!%p675_p4)
}
   0xc   :  { %s746_s21 = smov 256   ;;  %s747_s22 = smov 16  }
   0xd   :  { %36 = dma.hbm_to_vmem [thread:$0]  %s909_s1, 4096, %s31_s19, [#allocation6], %s746_s21, %s746_s21, %s747_s22  }
   0xe   :  { %s748_s25 = smov [#allocation2]  }
   0xf   :  { %s18_s26 = sshll.u32 %s748_s25, 4  ;;  %s19_s26 = int_to_ptr.vmem [resolvable:$true] %s18_s26 }
  0x10   :  { %s687_s27 = scalar_lea.vmem %s19_s26, 2048  ;;  %p692_p6 = scmp.lt.s32.totalorder %s19_s26, %s19_s26 }
  0x11   :  { %p688_p5 = scmp.ne.s32.totalorder %s19_s26, %s687_s27  ;;  %p693_p7 = scmp.lt.s32.totalorder %s687_s27, %s687_s27 }
  0x13   :  { %p694_p8 = por %p693_p7, %p692_p6 }
  0x15   :  { %p695_p9 = pnand %p694_p8, %p688_p5 }
  0x17   :  { %698 = shalt.err (!%p695_p9)
}
  0x18   :  { %s749_s28 = smov 128   ;;  %s750_s29 = smov 8  }
  0x19   :  { %24 = dma.hbm_to_vmem [thread:$0]  %s908_s0, 2048, %s19_s26, [#allocation3], %s749_s28, %s749_s28, %s750_s29  }
  0x1a   :  { %s751_s1 = smov [#allocation7]  }
  0x1b   :  { %s44_s7 = sshll.u32 %s751_s1, 4  ;;  %s45_s7 = int_to_ptr.vmem [resolvable:$true] %s44_s7 }
  0x1c   :  { %s707_s8 = scalar_lea.vmem %s45_s7, 2048  ;;  %p712_p11 = scmp.lt.s32.totalorder %s45_s7, %s45_s7 }
  0x1d   :  { %p708_p10 = scmp.ne.s32.totalorder %s45_s7, %s707_s8  ;;  %p713_p12 = scmp.lt.s32.totalorder %s707_s8, %s707_s8 }
  0x1f   :  { %p714_p13 = por %p713_p12, %p712_p11 }
  0x21   :  { %p715_p0 = pnand %p714_p13, %p708_p10 }
  0x23   :  { %718 = shalt.err (!%p715_p0)
}
  0x24   :  { %50 = dma.hbm_to_vmem [thread:$0]  %s911_s3, 2048, %s45_s7, [#allocation6], %s749_s28, %s749_s28, %s750_s29  }
  0x25   :  { %739 = dma.done.wait [#allocation3], 2048  }
  0x26   :  { %740 = vsyncadd [#allocation3], 4294965248 }
  0x27   :  { %741 = dma.done.wait [#allocation6], 6144  }
  0x28   :  { %742 = vsyncadd [#allocation6], 4294961152  ;;  %v752_v0 = vmov 0.0   ;;  %v109_v1 = vld [vmem:[#allocation5 + $0xf8] sm:$0xff]  ;;  %v108_v2 = vld [vmem:[#allocation5 + $0xf0] sm:$0xff] }
  0x29   :  { %174 = vmatprep.mubr.f32.mxu0 %v752_v0  ;;  %v107_v3 = vld [vmem:[#allocation5 + $0xe8] sm:$0xff]  ;;  %110 = vmatprep.subr.mxu0 %v109_v1  ;;  %v106_v4 = vld [vmem:[#allocation5 + $0xe0] sm:$0xff]  ;;  %v105_v5 = vld [vmem:[#allocation5 + $0xd8] sm:$0xff] }
  0x2a   :  { %111 = vmatpush1.msra.mxu0 %v108_v2  ;;  %v104_v6 = vld [vmem:[#allocation5 + $0xd0] sm:$0xff]  ;;  %v103_v7 = vld [vmem:[#allocation5 + $0xc8] sm:$0xff]  ;;  %v102_v8 = vld [vmem:[#allocation5 + $0xc0] sm:$0xff] }
  0x2b   :  { %112 = vmatprep.subr.mxu0 %v107_v3  ;;  %v101_v9 = vld [vmem:[#allocation5 + $0xb8] sm:$0xff]  ;;  %v100_v10 = vld [vmem:[#allocation5 + $0xb0] sm:$0xff]  ;;  %v99_v11 = vld [vmem:[#allocation5 + $0xa8] sm:$0xff] }
  0x2c   :  { %113 = vmatpush1.msra.mxu0 %v106_v4  ;;  %v98_v12 = vld [vmem:[#allocation5 + $0xa0] sm:$0xff]  ;;  %v97_v13 = vld [vmem:[#allocation5 + $0x98] sm:$0xff]  ;;  %v96_v14 = vld [vmem:[#allocation5 + $0x90] sm:$0xff] }
  0x2d   :  { %114 = vmatprep.subr.mxu0 %v105_v5  ;;  %v95_v15 = vld [vmem:[#allocation5 + $0x88] sm:$0xff]  ;;  %v94_v16 = vld [vmem:[#allocation5 + $0x80] sm:$0xff]  ;;  %v93_v17 = vld [vmem:[#allocation5 + $0x78] sm:$0xff] }
  0x2e   :  { %115 = vmatpush1.msra.mxu0 %v104_v6  ;;  %v92_v18 = vld [vmem:[#allocation5 + $0x70] sm:$0xff]  ;;  %v91_v19 = vld [vmem:[#allocation5 + $0x68] sm:$0xff]  ;;  %v348_v20 = vld [vmem:[#allocation7 + $0x78] sm:$0xff] }
  0x2f   :  { %116 = vmatprep.subr.mxu0 %v103_v7  ;;  %v347_v21 = vld [vmem:[#allocation7 + $0x70] sm:$0xff]  ;;  %v90_v22 = vld [vmem:[#allocation5 + $0x60] sm:$0xff]  ;;  %594 = vmatprep.subr.mxu1 %v348_v20  ;;  %v89_v23 = vld [vmem:[#allocation5 + $0x58] sm:$0xff] }
  0x30   :  { %117 = vmatpush1.msra.mxu0 %v102_v8  ;;  %595 = vmatpush3.msra.mxu1 %v348_v20  ;;  %v346_v24 = vld [vmem:[#allocation7 + $0x68] sm:$0xff]  ;;  %v88_v25 = vld [vmem:[#allocation5 + $0x50] sm:$0xff]  ;;  %v345_v27 = vld [vmem:[#allocation7 + $0x60] sm:$0xff] }
  0x31   :  { %118 = vmatprep.subr.mxu0 %v101_v9  ;;  %596 = vmatprep.subr.mxu1 %v347_v21  ;;  %v87_v26 = vld [vmem:[#allocation5 + $0x48] sm:$0xff]  ;;  %v86_v28 = vld [vmem:[#allocation5 + $0x40] sm:$0xff]  ;;  %v85_v29 = vld [vmem:[#allocation5 + $0x38] sm:$0xff] }
  0x32   :  { %119 = vmatpush1.msra.mxu0 %v100_v10  ;;  %597 = vmatpush3.msra.mxu1 %v347_v21  ;;  %v344_v30 = vld [vmem:[#allocation7 + $0x58] sm:$0xff]  ;;  %v84_v31 = vld [vmem:[#allocation5 + $0x30] sm:$0xff]  ;;  %v83_v32 = vld [vmem:[#allocation5 + $0x28] sm:$0xff] }
  0x33   :  { %120 = vmatprep.subr.mxu0 %v99_v11  ;;  %598 = vmatprep.subr.mxu1 %v346_v24  ;;  %v343_v33 = vld [vmem:[#allocation7 + $0x50] sm:$0xff]  ;;  %v82_v34 = vld [vmem:[#allocation5 + $0x20] sm:$0xff]  ;;  %v81_v35 = vld [vmem:[#allocation5 + $0x18] sm:$0xff] }
  0x34   :  { %121 = vmatpush1.msra.mxu0 %v98_v12  ;;  %599 = vmatpush3.msra.mxu1 %v346_v24  ;;  %v342_v36 = vld [vmem:[#allocation7 + $0x48] sm:$0xff]  ;;  %v80_v37 = vld [vmem:[#allocation5 + $0x10] sm:$0xff]  ;;  %v341_v39 = vld [vmem:[#allocation7 + $0x40] sm:$0xff] }
  0x35   :  { %122 = vmatprep.subr.mxu0 %v97_v13  ;;  %600 = vmatprep.subr.mxu1 %v345_v27  ;;  %v79_v38 = vld [vmem:[#allocation5 + $0x8] sm:$0xff]  ;;  %v78_v40 = vld [vmem:[#allocation5] sm:$0xff]  ;;  %v340_v42 = vld [vmem:[#allocation7 + $0x38] sm:$0xff] }
  0x36   :  { %123 = vmatpush1.msra.mxu0 %v96_v14  ;;  %601 = vmatpush3.msra.mxu1 %v345_v27  ;;  %v62_v41 = vld [vmem:[#allocation2] sm:$0xff]  ;;  %v339_v43 = vld [vmem:[#allocation7 + $0x30] sm:$0xff]  ;;  %v63_v44 = vld [vmem:[#allocation2 + $0x8] sm:$0xff] }
  0x37   :  { %124 = vmatprep.subr.mxu0 %v95_v15  ;;  %602 = vmatprep.subr.mxu1 %v344_v30  ;;  %v338_v45 = vld [vmem:[#allocation7 + $0x28] sm:$0xff]  ;;  %v337_v46 = vld [vmem:[#allocation7 + $0x20] sm:$0xff]  ;;  %v64_v47 = vld [vmem:[#allocation2 + $0x10] sm:$0xff] }
  0x38   :  { %125 = vmatpush1.msra.mxu0 %v94_v16  ;;  %603 = vmatpush3.msra.mxu1 %v344_v30  ;;  %v65_v48 = vld [vmem:[#allocation2 + $0x18] sm:$0xff]  ;;  %v66_v49 = vld [vmem:[#allocation2 + $0x20] sm:$0xff]  ;;  %v67_v50 = vld [vmem:[#allocation2 + $0x28] sm:$0xff] }
  0x39   :  { %126 = vmatprep.subr.mxu0 %v93_v17  ;;  %604 = vmatprep.subr.mxu1 %v343_v33  ;;  %v68_v51 = vld [vmem:[#allocation2 + $0x30] sm:$0xff]  ;;  %v69_v52 = vld [vmem:[#allocation2 + $0x38] sm:$0xff]  ;;  %v70_v53 = vld [vmem:[#allocation2 + $0x40] sm:$0xff] }
  0x3a   :  { %127 = vmatpush1.msra.mxu0 %v92_v18  ;;  %605 = vmatpush3.msra.mxu1 %v343_v33  ;;  %v71_v54 = vld [vmem:[#allocation2 + $0x48] sm:$0xff]  ;;  %v72_v55 = vld [vmem:[#allocation2 + $0x50] sm:$0xff]  ;;  %v73_v56 = vld [vmem:[#allocation2 + $0x58] sm:$0xff] }
  0x3b   :  { %128 = vmatprep.subr.mxu0 %v91_v19  ;;  %606 = vmatprep.subr.mxu1 %v342_v36  ;;  %v74_v57 = vld [vmem:[#allocation2 + $0x60] sm:$0xff]  ;;  %v75_v58 = vld [vmem:[#allocation2 + $0x68] sm:$0xff]  ;;  %v76_v59 = vld [vmem:[#allocation2 + $0x70] sm:$0xff] }
  0x3c   :  { %129 = vmatpush1.msra.mxu0 %v90_v22  ;;  %607 = vmatpush3.msra.mxu1 %v342_v36  ;;  %v77_v60 = vld [vmem:[#allocation2 + $0x78] sm:$0xff]  ;;  %v335_v62 = vld [vmem:[#allocation7 + $0x10] sm:$0xff]  ;;  %v334_v63 = vld [vmem:[#allocation7 + $0x8] sm:$0xff] }
  0x3d   :  { %130 = vmatprep.subr.mxu0 %v89_v23  ;;  %608 = vmatprep.subr.mxu1 %v341_v39  ;;  %v336_v61 = vld [vmem:[#allocation7 + $0x18] sm:$0xff]  ;;  %v333_v1 = vld [vmem:[#allocation7] sm:$0xff] }
  0x3e   :  { %131 = vmatpush1.msra.mxu0 %v88_v25  ;;  %609 = vmatpush3.msra.mxu1 %v341_v39  ;;  %v818_v2 = vld [vmem:[%s910_s2] ss:$0 sm:$0xff] }
  0x3f   :  { %132 = vmatprep.subr.mxu0 %v87_v26  ;;  %610 = vmatprep.subr.mxu1 %v340_v42 }
  0x40   :  { %133 = vmatpush1.msra.mxu0 %v86_v28  ;;  %611 = vmatpush3.msra.mxu1 %v340_v42 }
  0x41   :  { %134 = vmatprep.subr.mxu0 %v85_v29  ;;  %612 = vmatprep.subr.mxu1 %v339_v43 }
  0x42   :  { %135 = vmatpush1.msra.mxu0 %v84_v31  ;;  %613 = vmatpush3.msra.mxu1 %v339_v43 }
  0x43   :  { %136 = vmatprep.subr.mxu0 %v83_v32  ;;  %614 = vmatprep.subr.mxu1 %v338_v45 }
  0x44   :  { %137 = vmatpush1.msra.mxu0 %v82_v34  ;;  %615 = vmatpush3.msra.mxu1 %v338_v45 }
  0x45   :  { %138 = vmatprep.subr.mxu0 %v81_v35  ;;  %616 = vmatprep.subr.mxu1 %v337_v46 }
  0x46   :  { %139 = vmatpush1.msra.mxu0 %v80_v37  ;;  %617 = vmatpush3.msra.mxu1 %v337_v46 }
  0x47   :  { %140 = vmatprep.subr.mxu0 %v79_v38  ;;  %618 = vmatprep.subr.mxu1 %v336_v61 }
  0x48   :  { %141 = vmatpush1.msra.mxu0 %v78_v40  ;;  %619 = vmatpush3.msra.mxu1 %v336_v61 }
  0x49   :  { %175 = vmatmul.mubr.f32.vlgmr.msra.gmra.mxu0 %v62_v41  ;;  %620 = vmatprep.subr.mxu1 %v335_v62 }
  0x4a   :  { %180 = vmatprep.mubr.f32.mxu0 %v752_v0  ;;  %621 = vmatpush3.msra.mxu1 %v335_v62 }
  0x4b   :  { %622 = vmatprep.subr.mxu1 %v334_v63 }
  0x4c   :  { %623 = vmatpush3.msra.mxu1 %v334_v63 }
  0x4d   :  { %181 = vmatmul.mubr.f32.gmra.mxu0 %v63_v44  ;;  %624 = vmatprep.subr.mxu1 %v333_v1 }
  0x4e   :  { %186 = vmatprep.mubr.f32.mxu0 %v752_v0  ;;  %625 = vmatpush3.msra.mxu1 %v333_v1 }
  0x51   :  { %187 = vmatmul.mubr.f32.gmra.mxu0 %v64_v47 }
  0x52   :  { %192 = vmatprep.mubr.f32.mxu0 %v752_v0 }
  0x55   :  { %193 = vmatmul.mubr.f32.gmra.mxu0 %v65_v48 }
  0x56   :  { %198 = vmatprep.mubr.f32.mxu0 %v752_v0 }
  0x59   :  { %199 = vmatmul.mubr.f32.gmra.mxu0 %v66_v49 }
  0x5a   :  { %204 = vmatprep.mubr.f32.mxu0 %v752_v0 }
  0x5d   :  { %205 = vmatmul.mubr.f32.gmra.mxu0 %v67_v50 }
  0x5e   :  { %210 = vmatprep.mubr.f32.mxu0 %v752_v0 }
  0x61   :  { %211 = vmatmul.mubr.f32.gmra.mxu0 %v68_v51 }
  0x62   :  { %216 = vmatprep.mubr.f32.mxu0 %v752_v0 }
  0x65   :  { %217 = vmatmul.mubr.f32.gmra.mxu0 %v69_v52 }
  0x66   :  { %222 = vmatprep.mubr.f32.mxu0 %v752_v0 }
  0x69   :  { %223 = vmatmul.mubr.f32.gmra.mxu0 %v70_v53 }
  0x6a   :  { %228 = vmatprep.mubr.f32.mxu0 %v752_v0 }
  0x6d   :  { %229 = vmatmul.mubr.f32.gmra.mxu0 %v71_v54 }
  0x6e   :  { %234 = vmatprep.mubr.f32.mxu0 %v752_v0 }
  0x71   :  { %235 = vmatmul.mubr.f32.gmra.mxu0 %v72_v55 }
  0x72   :  { %240 = vmatprep.mubr.f32.mxu0 %v752_v0 }
  0x75   :  { %241 = vmatmul.mubr.f32.gmra.mxu0 %v73_v56 }
  0x76   :  { %246 = vmatprep.mubr.f32.mxu0 %v752_v0 }
  0x79   :  { %247 = vmatmul.mubr.f32.gmra.mxu0 %v74_v57 }
  0x7a   :  { %252 = vmatprep.mubr.f32.mxu0 %v752_v0 }
  0x7d   :  { %253 = vmatmul.mubr.f32.gmra.mxu0 %v75_v58 }
  0x7e   :  { %258 = vmatprep.mubr.f32.mxu0 %v752_v0 }
  0x81   :  { %259 = vmatmul.mubr.f32.gmra.mxu0 %v76_v59 }
  0x82   :  { %264 = vmatprep.mubr.f32.mxu0 %v752_v0 }
  0x85   :  { %265 = vmatmul.mubr.f32.gmra.mxu0 %v77_v60 }
 0x109   :  { %v176_v0 = vpop.f32.mrf.mxu0 }
 0x10a   :  { %v278_v3 = vadd.f32 %v818_v2, %v176_v0  ;;  %v869_v0 = vld [vmem:[%s912_s4] ss:$0 sm:$0xff]  ;;  %s753_s4 = smov [#allocation8]  }
 0x10b   :  { %v821_v4 = vpop.f32.mrf.mxu0  ;;  %s547_s12 = sshll.u32 %s753_s4, 4  ;;  %s548_s12 = int_to_ptr.vmem [resolvable:$true] %s547_s12 }
 0x10c   :  { %v294_v5 = vmax.f32 %v278_v3, 0.0  ;;  %s719_s13 = scalar_lea.vmem %s548_s12, 2048  ;;  %p724_p2 = scmp.lt.s32.totalorder %s548_s12, %s548_s12 }
 0x10d   :  { %v182_v6 = vpop.f32.mrf.mxu0  ;;  %p720_p1 = scmp.ne.s32.totalorder %s548_s12, %s719_s13  ;;  %p725_p3 = scmp.lt.s32.totalorder %s719_s13, %s719_s13 }
 0x10e   :  { %v279_v7 = vadd.f32 %v818_v2, %v182_v6  ;;  %626 = vmatprep.mubr.f32.mxu1 %v294_v5  ;;  %v317_v6 = vadd.f32 %v869_v0, %v821_v4 }
 0x10f   :  { %v824_v8 = vpop.f32.mrf.mxu0  ;;  %p726_p4 = por %p725_p3, %p724_p2 }
 0x110   :  { %v295_v9 = vmax.f32 %v279_v7, 0.0  ;;  %v318_v3 = vadd.f32 %v869_v0, %v824_v8 }
 0x111   :  { %v188_v10 = vpop.f32.mrf.mxu0  ;;  %p727_p5 = pnand %p726_p4, %p720_p1 }
 0x112   :  { %v280_v11 = vadd.f32 %v818_v2, %v188_v10  ;;  %627 = vmatmul.mubr.f32.vlgmr.msra.gmra.mxu1 %v295_v9 }
 0x113   :  { %v827_v12 = vpop.f32.mrf.mxu0 }
 0x114   :  { %v296_v13 = vmax.f32 %v280_v11, 0.0 }
 0x115   :  { %v194_v14 = vpop.f32.mrf.mxu0 }
 0x116   :  { %v281_v15 = vadd.f32 %v818_v2, %v194_v14  ;;  %629 = vmatprep.mubr.f32.mxu1 %v296_v13 }
 0x117   :  { %v830_v16 = vpop.f32.mrf.mxu0 }
 0x118   :  { %v297_v17 = vmax.f32 %v281_v15, 0.0  ;;  %v320_v13 = vadd.f32 %v869_v0, %v830_v16  ;;  %v319_v15 = vadd.f32 %v869_v0, %v827_v12 }
 0x119   :  { %v200_v18 = vpop.f32.mrf.mxu0 }
 0x11a   :  { %v282_v19 = vadd.f32 %v818_v2, %v200_v18  ;;  %630 = vmatmul.mubr.f32.gmra.mxu1 %v297_v17 }
 0x11b   :  { %v833_v20 = vpop.f32.mrf.mxu0 }
 0x11c   :  { %v298_v21 = vmax.f32 %v282_v19, 0.0 }
 0x11d   :  { %v206_v22 = vpop.f32.mrf.mxu0 }
 0x11e   :  { %v283_v23 = vadd.f32 %v818_v2, %v206_v22  ;;  %632 = vmatprep.mubr.f32.mxu1 %v298_v21 }
 0x11f   :  { %v836_v24 = vpop.f32.mrf.mxu0 }
 0x120   :  { %v299_v25 = vmax.f32 %v283_v23, 0.0  ;;  %v322_v21 = vadd.f32 %v869_v0, %v836_v24  ;;  %v321_v23 = vadd.f32 %v869_v0, %v833_v20 }
 0x121   :  { %v212_v26 = vpop.f32.mrf.mxu0 }
 0x122   :  { %v284_v27 = vadd.f32 %v818_v2, %v212_v26  ;;  %633 = vmatmul.mubr.f32.gmra.mxu1 %v299_v25 }
 0x123   :  { %v839_v28 = vpop.f32.mrf.mxu0 }
 0x124   :  { %v300_v29 = vmax.f32 %v284_v27, 0.0 }
 0x125   :  { %v218_v30 = vpop.f32.mrf.mxu0 }
 0x126   :  { %v285_v31 = vadd.f32 %v818_v2, %v218_v30  ;;  %635 = vmatprep.mubr.f32.mxu1 %v300_v29 }
 0x127   :  { %v842_v32 = vpop.f32.mrf.mxu0 }
 0x128   :  { %v301_v33 = vmax.f32 %v285_v31, 0.0  ;;  %v324_v29 = vadd.f32 %v869_v0, %v842_v32  ;;  %v323_v31 = vadd.f32 %v869_v0, %v839_v28 }
 0x129   :  { %v224_v34 = vpop.f32.mrf.mxu0 }
 0x12a   :  { %v286_v35 = vadd.f32 %v818_v2, %v224_v34  ;;  %636 = vmatmul.mubr.f32.gmra.mxu1 %v301_v33 }
 0x12b   :  { %v845_v36 = vpop.f32.mrf.mxu0 }
 0x12c   :  { %v302_v37 = vmax.f32 %v286_v35, 0.0 }
 0x12d   :  { %v230_v38 = vpop.f32.mrf.mxu0 }
 0x12e   :  { %v287_v39 = vadd.f32 %v818_v2, %v230_v38  ;;  %638 = vmatprep.mubr.f32.mxu1 %v302_v37 }
 0x12f   :  { %v848_v40 = vpop.f32.mrf.mxu0 }
 0x130   :  { %v303_v41 = vmax.f32 %v287_v39, 0.0  ;;  %v326_v37 = vadd.f32 %v869_v0, %v848_v40  ;;  %v325_v39 = vadd.f32 %v869_v0, %v845_v36 }
 0x131   :  { %v236_v42 = vpop.f32.mrf.mxu0 }
 0x132   :  { %v288_v43 = vadd.f32 %v818_v2, %v236_v42  ;;  %639 = vmatmul.mubr.f32.gmra.mxu1 %v303_v41 }
 0x133   :  { %v851_v44 = vpop.f32.mrf.mxu0 }
 0x134   :  { %v304_v45 = vmax.f32 %v288_v43, 0.0 }
 0x135   :  { %v242_v46 = vpop.f32.mrf.mxu0 }
 0x136   :  { %v289_v47 = vadd.f32 %v818_v2, %v242_v46  ;;  %641 = vmatprep.mubr.f32.mxu1 %v304_v45 }
 0x137   :  { %v854_v48 = vpop.f32.mrf.mxu0 }
 0x138   :  { %v305_v49 = vmax.f32 %v289_v47, 0.0  ;;  %v328_v45 = vadd.f32 %v869_v0, %v854_v48  ;;  %v327_v47 = vadd.f32 %v869_v0, %v851_v44 }
 0x139   :  { %v248_v50 = vpop.f32.mrf.mxu0 }
 0x13a   :  { %v290_v51 = vadd.f32 %v818_v2, %v248_v50  ;;  %642 = vmatmul.mubr.f32.gmra.mxu1 %v305_v49 }
 0x13b   :  { %v857_v52 = vpop.f32.mrf.mxu0 }
 0x13c   :  { %v306_v53 = vmax.f32 %v290_v51, 0.0 }
 0x13d   :  { %v254_v54 = vpop.f32.mrf.mxu0 }
 0x13e   :  { %v291_v55 = vadd.f32 %v818_v2, %v254_v54  ;;  %644 = vmatprep.mubr.f32.mxu1 %v306_v53 }
 0x13f   :  { %v860_v56 = vpop.f32.mrf.mxu0 }
 0x140   :  { %v307_v57 = vmax.f32 %v291_v55, 0.0  ;;  %v330_v53 = vadd.f32 %v869_v0, %v860_v56  ;;  %v329_v55 = vadd.f32 %v869_v0, %v857_v52 }
 0x141   :  { %v260_v58 = vpop.f32.mrf.mxu0 }
 0x142   :  { %v292_v59 = vadd.f32 %v818_v2, %v260_v58  ;;  %645 = vmatmul.mubr.f32.gmra.mxu1 %v307_v57 }
 0x143   :  { %v863_v60 = vpop.f32.mrf.mxu0 }
 0x144   :  { %v308_v61 = vmax.f32 %v292_v59, 0.0 }
 0x145   :  { %v266_v62 = vpop.f32.mrf.mxu0 }
 0x146   :  { %v293_v63 = vadd.f32 %v818_v2, %v266_v62  ;;  %647 = vmatprep.mubr.f32.mxu1 %v308_v61 }
 0x147   :  { %v268_v61 = vpop.f32.mrf.mxu0 }
 0x148   :  { %v309_v1 = vmax.f32 %v293_v63, 0.0  ;;  %v332_v62 = vadd.f32 %v869_v0, %v268_v61 }
 0x14a   :  { %648 = vmatmul.mubr.f32.gmra.mxu1 %v309_v1  ;;  %v331_v1 = vadd.f32 %v869_v0, %v863_v60 }
 0x1d2   :  { %v628_v5 = vpop.f32.mrf.mxu1 }
 0x1d3   :  { %v495_v7 = vadd.f32 %v628_v5, %v318_v3 }
 0x1d4   :  { %v415_v9 = vpop.f32.mrf.mxu1 }
 0x1d5   :  { %v511_v10 = vmax.f32 %v495_v7, 0.0  ;;  %v494_v11 = vadd.f32 %v415_v9, %v317_v6 }
 0x1d7   :  { %527 = vst [vmem:[#allocation8 + $0x8] sm:$0xff] %v511_v10  ;;  %v510_v2 = vmax.f32 %v494_v11, 0.0 }
 0x1d9   :  { %526 = vst [vmem:[#allocation8] sm:$0xff] %v510_v2 }
 0x1da   :  { %v631_v14 = vpop.f32.mrf.mxu1 }
 0x1db   :  { %v497_v17 = vadd.f32 %v631_v14, %v320_v13 }
 0x1dc   :  { %v425_v8 = vpop.f32.mrf.mxu1 }
 0x1dd   :  { %v513_v18 = vmax.f32 %v497_v17, 0.0  ;;  %v496_v19 = vadd.f32 %v425_v8, %v319_v15 }
 0x1df   :  { %529 = vst [vmem:[#allocation8 + $0x18] sm:$0xff] %v513_v18  ;;  %v512_v4 = vmax.f32 %v496_v19, 0.0 }
 0x1e1   :  { %528 = vst [vmem:[#allocation8 + $0x10] sm:$0xff] %v512_v4 }
 0x1e2   :  { %v634_v22 = vpop.f32.mrf.mxu1 }
 0x1e3   :  { %v499_v16 = vadd.f32 %v634_v22, %v322_v21 }
 0x1e4   :  { %v435_v25 = vpop.f32.mrf.mxu1 }
 0x1e5   :  { %v515_v26 = vmax.f32 %v499_v16, 0.0  ;;  %v498_v27 = vadd.f32 %v435_v25, %v321_v23 }
 0x1e7   :  { %531 = vst [vmem:[#allocation8 + $0x28] sm:$0xff] %v515_v26  ;;  %v514_v12 = vmax.f32 %v498_v27, 0.0 }
 0x1e9   :  { %530 = vst [vmem:[#allocation8 + $0x20] sm:$0xff] %v514_v12 }
 0x1ea   :  { %v637_v30 = vpop.f32.mrf.mxu1 }
 0x1eb   :  { %v501_v24 = vadd.f32 %v637_v30, %v324_v29 }
 0x1ec   :  { %v445_v33 = vpop.f32.mrf.mxu1 }
 0x1ed   :  { %v517_v34 = vmax.f32 %v501_v24, 0.0  ;;  %v500_v35 = vadd.f32 %v445_v33, %v323_v31 }
 0x1ef   :  { %533 = vst [vmem:[#allocation8 + $0x38] sm:$0xff] %v517_v34  ;;  %v516_v20 = vmax.f32 %v500_v35, 0.0 }
 0x1f1   :  { %532 = vst [vmem:[#allocation8 + $0x30] sm:$0xff] %v516_v20 }
 0x1f2   :  { %v640_v38 = vpop.f32.mrf.mxu1 }
 0x1f3   :  { %v503_v32 = vadd.f32 %v640_v38, %v326_v37 }
 0x1f4   :  { %v455_v41 = vpop.f32.mrf.mxu1 }
 0x1f5   :  { %v519_v42 = vmax.f32 %v503_v32, 0.0  ;;  %v502_v43 = vadd.f32 %v455_v41, %v325_v39 }
 0x1f7   :  { %535 = vst [vmem:[#allocation8 + $0x48] sm:$0xff] %v519_v42  ;;  %v518_v28 = vmax.f32 %v502_v43, 0.0 }
 0x1f9   :  { %534 = vst [vmem:[#allocation8 + $0x40] sm:$0xff] %v518_v28 }
 0x1fa   :  { %v643_v46 = vpop.f32.mrf.mxu1 }
 0x1fb   :  { %v505_v40 = vadd.f32 %v643_v46, %v328_v45 }
 0x1fc   :  { %v465_v49 = vpop.f32.mrf.mxu1 }
 0x1fd   :  { %v521_v50 = vmax.f32 %v505_v40, 0.0  ;;  %v504_v51 = vadd.f32 %v465_v49, %v327_v47 }
 0x1ff   :  { %537 = vst [vmem:[#allocation8 + $0x58] sm:$0xff] %v521_v50  ;;  %v520_v36 = vmax.f32 %v504_v51, 0.0 }
 0x201   :  { %536 = vst [vmem:[#allocation8 + $0x50] sm:$0xff] %v520_v36 }
 0x202   :  { %v646_v54 = vpop.f32.mrf.mxu1 }
 0x203   :  { %v507_v48 = vadd.f32 %v646_v54, %v330_v53 }
 0x204   :  { %v475_v57 = vpop.f32.mrf.mxu1 }
 0x205   :  { %v523_v58 = vmax.f32 %v507_v48, 0.0  ;;  %v506_v59 = vadd.f32 %v475_v57, %v329_v55 }
 0x207   :  { %539 = vst [vmem:[#allocation8 + $0x68] sm:$0xff] %v523_v58  ;;  %v522_v44 = vmax.f32 %v506_v59, 0.0 }
 0x209   :  { %538 = vst [vmem:[#allocation8 + $0x60] sm:$0xff] %v522_v44 }
 0x20a   :  { %v649_v63 = vpop.f32.mrf.mxu1 }
 0x20b   :  { %v509_v56 = vadd.f32 %v649_v63, %v332_v62 }
 0x20c   :  { %v485_v3 = vpop.f32.mrf.mxu1 }
 0x20d   :  { %v525_v5 = vmax.f32 %v509_v56, 0.0  ;;  %v508_v52 = vadd.f32 %v485_v3, %v331_v1 }
 0x20f   :  { %541 = vst [vmem:[#allocation8 + $0x78] sm:$0xff] %v525_v5  ;;  %v524_v6 = vmax.f32 %v508_v52, 0.0 }
 0x211   :  { %540 = vst [vmem:[#allocation8 + $0x70] sm:$0xff] %v524_v6 }
 0x212   :  { %730 = shalt.err (!%p727_p5)
}
 0x213   :  { %553 = dma.vmem_to_hbm [thread:$0]  %s548_s12, 2048, %s913_s5, [#allocation4], %s749_s28, %s749_s28, %s750_s29  }
 0x214   :  { %743 = dma.done.wait [#allocation4], 2048  }
 0x215   :  { %744 = vsyncadd [#allocation4], 4294965248 }
 0x216   :  { %557 = vsyncpa [#allocation3], 1 }
 0x217   :  { %558 = vsyncpa [#allocation6], 1 }
 0x218   :  { %559 = vsyncpa [#allocation4], 1 }

</bundles_post_ra>
